<compile_context>
chip_gen: v5e
topology: v5e:2x2
jax: 0.10.0
libtpu: 0.0.40
codegen_flags: <defaults>
</compile_context>

<pallas_src>
import functools
import math

import jax
import jax.numpy as jnp
from jax.experimental import pallas as pl
from jax.experimental.pallas import tpu as pltpu


def _round_up(x, m):
    return ((x + m - 1) // m) * m


# --------------------------------------------------------------------------- #
# One SAGEConv layer (mean aggregation + fused lin_l/lin_r + L2 norm [+ ReLU]) #
# --------------------------------------------------------------------------- #
def _sage_conv_kernel(a_ref, xf_ref, xt_ref, w_ref, b_ref, o_ref, *, relu):
    # Mean aggregation for this row panel: [TM, N] @ [N, F] -> [TM, F] (f32 acc).
    agg = jnp.dot(a_ref[...], xf_ref[...], preferred_element_type=jnp.float32)

    # Fused lin_l / lin_r: concat along lanes, single MXU pass with K = 2F.
    cat = jnp.concatenate([agg.astype(w_ref.dtype), xt_ref[...]], axis=-1)
    h = jnp.dot(cat, w_ref[...], preferred_element_type=jnp.float32) + b_ref[...]

    # F.normalize(h, p=2, dim=-1), eps=1e-12  ==  h * rsqrt(max(sumsq, 1e-24)).
    ss = jnp.sum(h * h, axis=-1, keepdims=True)
    h = h * jax.lax.rsqrt(jnp.maximum(ss, 1e-24))

    if relu:
        h = jnp.maximum(h, 0.0)
    o_ref[...] = h.astype(o_ref.dtype)


def _sage_conv(a, x, w_cat, bias, *, tm, relu, out_dtype=jnp.float32):
    """a: [Np, Np] bf16 row-normalized adjacency; x: [Np, F] bf16;
    w_cat: [2F, Hp] bf16 ([W_l ; W_r]); bias: [1, Hp] f32."""
    n_pad = a.shape[0]
    f = x.shape[1]
    hp = w_cat.shape[1]
    grid = (n_pad // tm,)

    flops = 2 * n_pad * n_pad * f + 2 * n_pad * (2 * f) * hp
    bytes_accessed = (a.size * 2 + 2 * x.size * 2 + w_cat.size * 2
                      + bias.size * 4 + n_pad * hp * jnp.dtype(out_dtype).itemsize)

    return pl.pallas_call(
        functools.partial(_sage_conv_kernel, relu=relu),
        out_shape=jax.ShapeDtypeStruct((n_pad, hp), out_dtype),
        grid=grid,
        in_specs=[
            pl.BlockSpec((tm, n_pad), lambda i: (i, 0)),   # A row panel (streamed)
            pl.BlockSpec((n_pad, f), lambda i: (0, 0)),    # full X (grid-invariant)
            pl.BlockSpec((tm, f), lambda i: (i, 0)),       # self-feature row panel
            pl.BlockSpec((2 * f, hp), lambda i: (0, 0)),   # [W_l ; W_r] (resident)
            pl.BlockSpec((1, hp), lambda i: (0, 0)),       # bias (resident)
        ],
        out_specs=pl.BlockSpec((tm, hp), lambda i: (i, 0)),
        compiler_params=pltpu.CompilerParams(
            dimension_semantics=("parallel",),
            vmem_limit_bytes=48 * 1024 * 1024,
        ),
        cost_estimate=pl.CostEstimate(
            flops=int(flops),
            transcendentals=int(n_pad),
            bytes_accessed=int(bytes_accessed),
        ),
    )(a, x, x, w_cat, bias)


# --------------------------------------------------------------------------- #
# Full encoder forward                                                         #
# --------------------------------------------------------------------------- #
def sage_encoder_forward(x, edge_index, params, *, tm=256, bn_eps=1e-5):
    """x: [N, Fin] f32, edge_index: [2, E] int32. Returns [N, H] f32."""
    n, fin = x.shape
    h = params["w1_l"].shape[1]

    # Lane-dense padding of feature dims; row-panel padding of the node dim.
    fp = _round_up(fin, 128)
    hp = _round_up(h, 128)
    tm = _round_up(min(tm, _round_up(n, 8)), 8)
    n_pad = _round_up(n, tm)

    # Dense row-normalized mean-aggregation operator (glue; duplicate edges are
    # counted in numerator and degree, matching scatter_mean with repeated edges).
    a = build_mean_adjacency(edge_index, n, n_pad).astype(jnp.bfloat16)

    xp = jnp.zeros((n_pad, fp), jnp.float32).at[:n, :fin].set(x).astype(jnp.bfloat16)

    w1 = jnp.zeros((2 * fp, hp), jnp.float32)
    w1 = w1.at[:fin, :h].set(params["w1_l"]).at[fp:fp + fin, :h].set(params["w1_r"])
    b1 = jnp.zeros((1, hp), jnp.float32).at[:, :h].set(params["b1"])

    w2 = jnp.zeros((2 * hp, hp), jnp.float32)
    w2 = w2.at[:h, :h].set(params["w2_l"]).at[hp:hp + h, :h].set(params["w2_r"])
    b2 = jnp.zeros((1, hp), jnp.float32).at[:, :h].set(params["b2"])

    gamma = jnp.zeros((1, hp), jnp.float32).at[:, :h].set(params["bn_gamma"])
    beta = jnp.zeros((1, hp), jnp.float32).at[:, :h].set(params["bn_beta"])

    # ---- conv1 + L2 normalize + ReLU (row-panel streamed kernel) ------------
    h1 = _sage_conv(a, xp, w1.astype(jnp.bfloat16), b1, tm=tm, relu=True,
                    out_dtype=jnp.float32)

    # ---- BatchNorm1d with batch statistics over the real rows (tiny plain-JAX
    #      reduction; its affine is applied here so conv2 stays fully streamed).
    # NOTE: batch-stat BN + identity dropout == training-mode BN / eval-mode dropout,
    # matching the original kernel's documented semantics.
    h1_real = h1[:n, :]
    mu = jnp.mean(h1_real, axis=0, keepdims=True)
    var = jnp.mean(jnp.square(h1_real - mu), axis=0, keepdims=True)   # biased var
    scale = gamma * jax.lax.rsqrt(var + bn_eps)
    shift = beta - mu * scale
    # TODO(synk): Dropout implemented as identity (eval-mode / deterministic forward).
    h1_bn = (h1 * scale + shift).astype(jnp.bfloat16)

    # ---- conv2 + L2 normalize ------------------------------------------------
    h2 = _sage_conv(a, h1_bn, w2.astype(jnp.bfloat16), b2, tm=tm, relu=False,
                    out_dtype=jnp.float32)
    return h2[:n, :h]


def build_mean_adjacency(edge_index, num_nodes, padded_nodes=None):
    """Dense row-normalized adjacency equivalent to PyG scatter-mean aggregation.

    edge_index: [2, E] int32, messages flow source (row 0) -> target (row 1).
    Built at `padded_nodes`; padded rows/cols are zero (no leakage into real rows).
    """
    np_ = padded_nodes if padded_nodes is not None else num_nodes
    src, dst = edge_index[0], edge_index[1]
    a = jnp.zeros((np_, np_), jnp.float32).at[dst, src].add(1.0)
    deg = jnp.sum(a, axis=1, keepdims=True)
    return a / jnp.maximum(deg, 1.0)   # isolated nodes aggregate to 0 (scatter_mean)


def init_params(key, num_features, hidden):
    """Deterministic synthetic parameters (shapes match SAGEConv / BatchNorm1d)."""
    k1, k2, k3, k4, k5, k6 = jax.random.split(key, 6)
    s_in = 1.0 / math.sqrt(num_features)
    s_h = 1.0 / math.sqrt(hidden)
    # torch Linear weight is [out, in]; we store the transpose [in, out] for X @ W.
    return dict(
        w1_l=jax.random.uniform(k1, (num_features, hidden), jnp.float32, -s_in, s_in),
        w1_r=jax.random.uniform(k2, (num_features, hidden), jnp.float32, -s_in, s_in),
        b1=jax.random.uniform(k3, (1, hidden), jnp.float32, -s_in, s_in),
        bn_gamma=jnp.ones((1, hidden), jnp.float32),
        bn_beta=jnp.zeros((1, hidden), jnp.float32),
        w2_l=jax.random.uniform(k4, (hidden, hidden), jnp.float32, -s_h, s_h),
        w2_r=jax.random.uniform(k5, (hidden, hidden), jnp.float32, -s_h, s_h),
        b2=jax.random.uniform(k6, (1, hidden), jnp.float32, -s_h, s_h),
    )


if __name__ == "__main__":
    N = 64            # number of graph nodes
    NUM_FEATURES = 16
    HIDDEN = 32
    NUM_EDGES = 256

    key = jax.random.PRNGKey(0)
    kx, ke, kp = jax.random.split(key, 3)

    x = jax.random.normal(kx, (N, NUM_FEATURES), jnp.float32)
    edge_index = jax.random.randint(ke, (2, NUM_EDGES), 0, N, jnp.int32)
    params = init_params(kp, NUM_FEATURES, HIDDEN)

    # tm=32 -> grid=(2,) row panels at this toy size (exercises the streamed path).
    h = sage_encoder_forward(x, edge_index, params, tm=32)
    jax.block_until_ready(h)
    assert h.shape == (N, HIDDEN) and h.dtype == jnp.float32
    assert bool(jnp.all(jnp.isfinite(h)))
    print("KERNEL_OK")
</pallas_src>

<mosaic_0001>
module attributes {stable_mosaic.version = 11 : i64} {
  func.func @_sage_conv_kernel(%arg0: i32, %arg1: memref<32x64xbf16, #tpu.memory_space<vmem>>, %arg2: memref<64x128xbf16, #tpu.memory_space<vmem>>, %arg3: memref<32x128xbf16, #tpu.memory_space<vmem>>, %arg4: memref<256x128xbf16, #tpu.memory_space<vmem>>, %arg5: memref<1x128xf32, #tpu.memory_space<vmem>>, %arg6: memref<32x128xf32, #tpu.memory_space<vmem>>) attributes {dimension_semantics = [#tpu.dimension_semantics<parallel>], iteration_bounds = array<i64: 2>, scalar_prefetch = 0 : i64, scratch_operands = 0 : i64, tpu.core_type = #tpu.core_type<tc>, window_params = [{transform_indices = @transform_0, window_bounds = array<i64: 32, 64>}, {pipeline_mode = #tpu.pipeline_mode<synchronous>, transform_indices = @transform_1, window_bounds = array<i64: 64, 128>}, {transform_indices = @transform_2, window_bounds = array<i64: 32, 128>}, {pipeline_mode = #tpu.pipeline_mode<synchronous>, transform_indices = @transform_3, window_bounds = array<i64: 256, 128>}, {pipeline_mode = #tpu.pipeline_mode<synchronous>, transform_indices = @transform_4, window_bounds = array<i64: 1, 128>}, {transform_indices = @transform_5, window_bounds = array<i64: 32, 128>}]} {
    %c0 = arith.constant 0 : index
    %c0_0 = arith.constant 0 : index
    %0 = vector.load %arg1[%c0, %c0_0] : memref<32x64xbf16, #tpu.memory_space<vmem>>, vector<32x64xbf16>
    %c0_1 = arith.constant 0 : index
    %c0_2 = arith.constant 0 : index
    %1 = vector.load %arg2[%c0_1, %c0_2] : memref<64x128xbf16, #tpu.memory_space<vmem>>, vector<64x128xbf16>
    %cst = arith.constant dense<0.000000e+00> : vector<32x128xf32>
    %2 = tpu.matmul %0, %1, %cst {dimension_numbers = #tpu.dot_dimension_numbers<[1], [0], [0], [1], [0, 0, 1, 1], [], []>} : vector<32x64xbf16>, vector<64x128xbf16>, vector<32x128xf32> -> vector<32x128xf32>
    %3 = arith.truncf %2 : vector<32x128xf32> to vector<32x128xbf16>
    %c0_3 = arith.constant 0 : index
    %c0_4 = arith.constant 0 : index
    %4 = vector.load %arg3[%c0_3, %c0_4] : memref<32x128xbf16, #tpu.memory_space<vmem>>, vector<32x128xbf16>
    %5 = tpu.concatenate %3, %4 in 1 : vector<32x128xbf16>, vector<32x128xbf16> -> vector<32x256xbf16>
    %c0_5 = arith.constant 0 : index
    %c0_6 = arith.constant 0 : index
    %6 = vector.load %arg4[%c0_5, %c0_6] : memref<256x128xbf16, #tpu.memory_space<vmem>>, vector<256x128xbf16>
    %cst_7 = arith.constant dense<0.000000e+00> : vector<32x128xf32>
    %7 = tpu.matmul %5, %6, %cst_7 {dimension_numbers = #tpu.dot_dimension_numbers<[1], [0], [0], [1], [0, 0, 1, 1], [], []>} : vector<32x256xbf16>, vector<256x128xbf16>, vector<32x128xf32> -> vector<32x128xf32>
    %c0_8 = arith.constant 0 : index
    %c0_9 = arith.constant 0 : index
    %8 = vector.load %arg5[%c0_8, %c0_9] : memref<1x128xf32, #tpu.memory_space<vmem>>, vector<1x128xf32>
    %9 = vector.broadcast %8 : vector<1x128xf32> to vector<32x128xf32>
    %10 = arith.addf %7, %9 : vector<32x128xf32>
    %11 = arith.mulf %10, %10 : vector<32x128xf32>
    %cst_10 = arith.constant dense<0.000000e+00> : vector<32xf32>
    %12 = vector.multi_reduction <add>, %11, %cst_10 [1] : vector<32x128xf32> to vector<32xf32>
    %13 = vector.shape_cast %12 : vector<32xf32> to vector<32x1xf32>
    %cst_11 = arith.constant 1.000000e-24 : f32
    %14 = vector.broadcast %cst_11 : f32 to vector<32x1xf32>
    %15 = arith.maximumf %13, %14 : vector<32x1xf32>
    %16 = math.rsqrt %15 : vector<32x1xf32>
    %17 = vector.broadcast %16 : vector<32x1xf32> to vector<32x128xf32>
    %18 = arith.mulf %10, %17 : vector<32x128xf32>
    %cst_12 = arith.constant 0.000000e+00 : f32
    %19 = vector.broadcast %cst_12 : f32 to vector<32x128xf32>
    %20 = arith.maximumf %18, %19 : vector<32x128xf32>
    %c0_13 = arith.constant 0 : index
    %c0_14 = arith.constant 0 : index
    %21 = vector.load %arg6[%c0_13, %c0_14] : memref<32x128xf32, #tpu.memory_space<vmem>>, vector<32x128xf32>
    tpu.vector_store %arg6[%c0_13, %c0_14], %20 {strides = array<i32>} : memref<32x128xf32, #tpu.memory_space<vmem>>, vector<32x128xf32>,
    return
  }
  func.func @transform_0(%arg0: i32) -> (i32, i32) {
    %c0_i32 = arith.constant 0 : i32
    %c0_i32_0 = arith.constant 0 : i32
    return %arg0, %c0_i32 : i32, i32
  }
  func.func @transform_1(%arg0: i32) -> (i32, i32) {
    %c0_i32 = arith.constant 0 : i32
    %c0_i32_0 = arith.constant 0 : i32
    %c0_i32_1 = arith.constant 0 : i32
    return %c0_i32, %c0_i32_0 : i32, i32
  }
  func.func @transform_2(%arg0: i32) -> (i32, i32) {
    %c0_i32 = arith.constant 0 : i32
    %c0_i32_0 = arith.constant 0 : i32
    return %arg0, %c0_i32 : i32, i32
  }
  func.func @transform_3(%arg0: i32) -> (i32, i32) {
    %c0_i32 = arith.constant 0 : i32
    %c0_i32_0 = arith.constant 0 : i32
    %c0_i32_1 = arith.constant 0 : i32
    return %c0_i32, %c0_i32_0 : i32, i32
  }
  func.func @transform_4(%arg0: i32) -> (i32, i32) {
    %c0_i32 = arith.constant 0 : i32
    %c0_i32_0 = arith.constant 0 : i32
    %c0_i32_1 = arith.constant 0 : i32
    return %c0_i32, %c0_i32_0 : i32, i32
  }
  func.func @transform_5(%arg0: i32) -> (i32, i32) {
    %c0_i32 = arith.constant 0 : i32
    %c0_i32_0 = arith.constant 0 : i32
    return %arg0, %c0_i32 : i32, i32
  }
}

</mosaic_0001>

<bundles_post_ra>
// kernel: tpu_custom_call.1
= control target key start
LH: loop header
LB: loop body
LE: loop exit
PB: predicated region body
PF: predicated region fallthrough
CT: control target
= control target key end

     0   :  { %s1488_s0 = inlined_call_operand.hbm [shape: bf16[64,64], index: 0, kind: input, shape index: {}]   ;;  %s1489_s1 = inlined_call_operand.hbm [shape: bf16[64,128], index: 1, kind: input, shape index: {}]   ;;  %s1490_s2 = inlined_call_operand.hbm [shape: bf16[64,128], index: 2, kind: input, shape index: {}]   ;;  %s1491_s3 = inlined_call_operand.hbm [shape: bf16[256,128], index: 3, kind: input, shape index: {}]   ;;  %s1492_s4 = inlined_call_operand.vmem [shape: f32[1,128], index: 4, kind: input, shape index: {}]   ;;  %s1493_s5 = inlined_call_operand.hbm [shape: f32[64,128], index: 5, kind: output, shape index: {}]  }
   0x1   :  { %1500 = sst [smem:[#allocation17_spill]] %s1489_s1 }
   0x2   :  { %10 = vsyncpa [#allocation3], 0 }
   0x3   :  { %12 = vsyncpa [#allocation3 + $0x1], 0 }
   0x4   :  { %13 = vsyncpa [#allocation6], 0 }
   0x5   :  { %14 = vsyncpa [#allocation4], 0 }
   0x6   :  { %16 = vsyncpa [#allocation4 + $0x1], 0  ;;  %s1267_s18 = smov 0   ;;  %s1269_s19 = smov 0  }
   0x7   :  { %s1271_s20 = smov 0   ;;  %s1273_s21 = smov 0  }
   0x8 LB: > { %1501 = sst [smem:[#allocation15_spill]] %s1225_s20  ;;  %s1288_s22 = sadd.s32 4294967295, %s1229_s21   ;;  %s1229_s21 = sphi %s1273_s21, %s1521_s21   ;;  %s1225_s20 = sphi %s1271_s20, %s1518_s20   ;;  %s1221_s19 = sphi %s1269_s19, %s1520_s19   ;;  %s1217_s18 = sphi %s1267_s18, %s1519_s18  }
   0x9   : > { %s791_s23 = sadd.s32 4294967294, %s1229_s21   ;;  %p42_p0 = scmp.ne.s32.totalorder %s1221_s19, %s1217_s18 }
   0xa   : > { %p1499_p1 = scmp.eq.s32.totalorder %s1288_s22, 0  ;;  %p155_p2 = scmp.eq.s32.totalorder %s1288_s22, 1 }
   0xb   : > { %p161_p3 = scmp.eq.s32.totalorder %s791_s23, 1  ;;  %p792_p5 = scmp.ge.s32.totalorder %s1229_s21, 1 }
   0xc   : > { %p1297_p4 = por %p1499_p1, %p42_p0  ;;  %p168_p7 = scmp.lt.s32.totalorder %s1229_s21, 3 }
   0xd   : > { %p1302_p6 = por %p161_p3, %p42_p0  ;;  %s1504_s1 = sld [smem:[#allocation17_spill]] }
   0xe   : > { %p1310_p8 = pnand %p792_p5, %p168_p7  ;;  %s1231_s30 = smov [#allocation5]  }
   0xf   : > { %s181_s6 = sshll.u32 %s1231_s30, 4  ;;  %s1324_s8 = sadd.s32 1, %s1229_s21   ;;  %s182_s6 = int_to_ptr.vmem [resolvable:$true] %s181_s6 }
  0x10   : > { %p960_p9 = pneg %p1310_p8  ;;  %s1494_s9 = smov 64  }
  0x11   : > { %s1496_s10 = smov 4   ;;  %s26_s11 = ssub.s32 %s1229_s21, %s1324_s8 }
  0x12   : > { %p1318_p10 = pnand %p960_p9, %p1499_p1  ;;  %s29_s12 = sadd.s32 1, %s1225_s20 }
  0x13   : > { %s179_s28 = sshll.u32 %s1504_s1, 4  ;;  %p27_p12 = scmp.eq.s32.totalorder %s26_s11, 0  ;;  %s180_s28 = int_to_ptr.hbm [resolvable:$true] %s179_s28 }
  0x14   : > { %963 = dma.hbm_to_vmem [thread:$0]  (!%p1318_p10), %s180_s28, 512, %s182_s6, [#allocation6], %s1494_s9, %s1494_s9, %s1496_s10  }
  0x15   : > { %p36_p13 = scmp.ne.s32.totalorder %s1225_s20, %s1221_s19  ;;  %p37_p0 = scmp.eq.s32.totalorder %s1229_s21, 0 }
  0x16   : > { %p980_p3 = scmp.lt.s32.totalorder %s1229_s21, 2  ;;  %s212_s15 = sand.u32 1, %s1229_s21  }
  0x17   : > { %s1339_s13 = scalar_select %p27_p12, %s1225_s20, %s29_s12  }
  0x18   : > { %p38_p5 = por %p37_p0, %p36_p13  ;;  %p1343_p7 = por %p155_p2, %p36_p13 }
  0x19   : > { %1507 = sst [smem:[#allocation16_spill]] %s1339_s13  ;;  %s214_s16 = sand.u32 1, %s1225_s20  }
  0x1a   : > { %s1349_s17 = sshll.u32 %s214_s16, 4  ;;  %s911_s23 = sshll.u32 %s1229_s21, 4 }
  0x1b   : > { %s221_s28 = scalar_lea.hbm %s1488_s0, %s911_s23  ;;  %s216_s30 = scalar_lea.vmem [#allocation2], %s1349_s17 }
  0x1c   : > { %s224_s6 = sshll.u32 %s216_s30, 4  ;;  %s222_s11 = sshll.u32 %s221_s28, 4  ;;  %s225_s6 = int_to_ptr.vmem [resolvable:$true] %s224_s6  ;;  %s223_s11 = int_to_ptr.hbm [resolvable:$true] %s222_s11 }
  0x1d   : > { %p1358_p2 = pnand %p980_p3, %p38_p5  ;;  %s243_s16 = scalar_lea.hbm %s1490_s2, %s911_s23 }
  0x1e   : > { %s244_s1 = sshll.u32 %s243_s16, 4  ;;  %s1365_s13 = scalar_lea.sflag [#allocation3], %s212_s15  ;;  %s245_s1 = int_to_ptr.hbm [resolvable:$true] %s244_s1 }
  0x1f   : > { %s1061_s26 = sshra.s32 %s223_s11, 4  ;;  %p1065_p12 = pneg %p1358_p2  ;;  %s1062_s26 = int_to_ptr.hbm [resolvable:$true] %s1061_s26 }
  0x20   : > { %s1063_s27 = scalar_lea.hbm %s1062_s26, 16  ;;  %s1068_s9 = scalar_lea.hbm %s1488_s0, 32 }
  0x21   : > { %p1064_p9 = scmp.ne.s32.totalorder %s1062_s26, %s1063_s27  ;;  %p1069_p3 = scmp.lt.s32.totalorder %s1062_s26, %s1488_s0 }
  0x22   : > { %p1070_p5 = scmp.lt.s32.totalorder %s1068_s9, %s1063_s27 }
  0x23   : > { %p1066_p13 = pnand %p1065_p12, %p1064_p9 }
  0x24   : > { %p1071_p11 = por %p1070_p5, %p1069_p3 }
  0x25   : > { %p1067_p0 = pneg %p1066_p13 }
  0x27   : > { %p1072_p1 = pnand %p1071_p11, %p1067_p0 }
  0x29   : > { %1075 = shalt.err (!%p1072_p1)
}
  0x2a   : > { %s1510_s15 = smov 4   ;;  %s1511_s23 = smov 64  }
  0x2b   : > { %970 = dma.hbm_to_vmem [thread:$0]  (!%p1358_p2), %s223_s11, 256, %s225_s6, %s1365_s13, %s1511_s23, %s1511_s23, %s1510_s15  }
  0x2c   : > { %s238_s16 = scalar_lea.vmem [#allocation7], %s1349_s17  ;;  %s193_s26 = sshll.u32 %s1491_s3, 4  ;;  %s194_s26 = int_to_ptr.hbm [resolvable:$true] %s193_s26 }
  0x2d   : > { %s246_s28 = sshll.u32 %s238_s16, 4  ;;  %s1234_s27 = smov [#allocation8]   ;;  %s247_s28 = int_to_ptr.vmem [resolvable:$true] %s246_s28 }
  0x2e   : > { %s195_s9 = sshll.u32 %s1234_s27, 4  ;;  %s1121_s10 = sshra.s32 %s245_s1, 4  ;;  %s196_s9 = int_to_ptr.vmem [resolvable:$true] %s195_s9  ;;  %s1122_s10 = int_to_ptr.hbm [resolvable:$true] %s1121_s10 }
  0x2f   : > { %966 = dma.hbm_to_vmem [thread:$0]  (!%p1318_p10), %s194_s26, 2048, %s196_s9, [#allocation6], %s1511_s23, %s1511_s23, %s1510_s15  }
  0x30   : > { %s1123_s6 = scalar_lea.hbm %s1122_s10, 16  ;;  %s1128_s16 = scalar_lea.hbm %s1490_s2, 32 }
  0x31   : > { %p1124_p1 = scmp.ne.s32.totalorder %s1122_s10, %s1123_s6  ;;  %p1129_p13 = scmp.lt.s32.totalorder %s1122_s10, %s1490_s2 }
  0x32   : > { %p1130_p0 = scmp.lt.s32.totalorder %s1128_s16, %s1123_s6 }
  0x33   : > { %p1126_p11 = pnand %p1124_p1, %p1065_p12 }
  0x34   : > { %p1131_p3 = por %p1130_p0, %p1129_p13 }
  0x35   : > { %p1127_p9 = pneg %p1126_p11 }
  0x37   : > { %p1132_p5 = pnand %p1131_p3, %p1127_p9 }
  0x39   : > { %1135 = shalt.err (!%p1132_p5)
}
  0x3a   : > { %973 = dma.hbm_to_vmem [thread:$0]  (!%p1358_p2), %s245_s1, 256, %s247_s28, %s1365_s13, %s1511_s23, %s1511_s23, %s1510_s15  }
  0x3b   : > { %258 = sbr.rel (%p1310_p8) target bundleno = 536 (0x218), region = 40  ;;  %s260_s7 = sand.u32 (!%p1310_p8), 1, %s1288_s22  }
  0x3c   : > { %s1412_s26 = sand.u32 (!%p1310_p8), 1, %s1221_s19   ;;  %s261_s9 = scalar_lea.sflag (!%p1310_p8), [#allocation3], %s260_s7 }
  0x3d   : > { %s803_s27 = sshll.u32 (!%p1310_p8), %s1412_s26, 4 }
  0x3e   : > { %s1415_s10 = scalar_lea.vmem (!%p1310_p8), [#allocation2], %s803_s27 }
  0x40   : > { %1196 = dma.done.wait (%p1297_p4), %s261_s9, 256  }
  0x41   : > { %1198 = vsyncadd (%p1297_p4), %s261_s9, 4294967040  ;;  %p1512_p10 = scmp.eq.s32.totalorder %s1288_s22, 0 }
  0x43   : > { %1200 = dma.done.wait (%p1512_p10), [#allocation6], 512   ;;  %p1513_p8 = pmov %p1512_p10 }
  0x44   : > { %s1425_s1 = scalar_lea.vmem [#allocation7], %s803_s27 }
  0x45   : > { %1202 = vsyncadd (%p1513_p8), [#allocation6], 4294966784 }
  0x46   : > { %1204 = dma.done.wait (%p1297_p4), %s261_s9, 256  }
  0x47   : > { %1206 = vsyncadd (%p1297_p4), %s261_s9, 4294967040  ;;  %p1514_p2 = pmov %p1513_p8 }
  0x49   : > { %1208 = dma.done.wait (%p1514_p2), [#allocation6], 2048   ;;  %p1515_p12 = pmov %p1514_p2 }
  0x4a   : > { %v918_v0 = vld [vmem:[#allocation5 + $0x18] sm:$0xff]  ;;  %v917_v1 = vld [vmem:[#allocation5 + $0x10] sm:$0xff]  ;;  %v916_v6 = vld [vmem:[#allocation5 + $0x8] sm:$0xff]  ;;  %vm367_vm0 = vcmask 523264   ;;  %s807_s13 = sshll.u32 %s1412_s26, 5  ;;  %s937_s15 = sshll.u32 %s1288_s22, 5 }
  0x4b   : > { %1210 = vsyncadd (%p1515_p12), [#allocation6], 4294965248  ;;  %378 = vmatpush.bf16.msra.mxu0 %v918_v0  ;;  %v936_v2 = vld [vmem:[#allocation8 + $0x78] sm:$0xff]  ;;  %v935_v4 = vld [vmem:[#allocation8 + $0x70] sm:$0xff]  ;;  %s1447_s12 = scalar_lea.vmem [#allocation9], %s807_s13  ;;  %s675_s6 = scalar_lea.hbm %s1493_s5, %s937_s15 }
  0x4c   : > { %v928_v3 = vld [vmem:[#allocation8 + $0x38] sm:$0xff]  ;;  %576 = vmatpush.bf16.msra.mxu2 %v936_v2  ;;  %v927_v5 = vld [vmem:[#allocation8 + $0x30] sm:$0xff]  ;;  %v934_v7 = vld [vmem:[#allocation8 + $0x68] sm:$0xff]  ;;  %s676_s17 = sshll.u32 %s1447_s12, 4  ;;  %s678_s11 = sshll.u32 %s675_s6, 4  ;;  %s677_s17 = int_to_ptr.vmem [resolvable:$true] %s676_s17  ;;  %s679_s11 = int_to_ptr.hbm [resolvable:$true] %s678_s11 }
  0x4d   : > { %557 = vmatpush.bf16.msra.mxu1 %v928_v3  ;;  %938 = vmatpush.bf16.msra.mxu3 %v928_v3  ;;  %v926_v8 = vld [vmem:[#allocation8 + $0x28] sm:$0xff]  ;;  %v915_v9 = vld [vmem:[#allocation5] sm:$0xff]  ;;  %v932_v13 = vld [vmem:[#allocation8 + $0x58] sm:$0xff]  ;;  %s664_s22 = scalar_lea.sflag [#allocation4], %s1412_s26  ;;  %s1165_s16 = sshra.s32 %s679_s11, 4  ;;  %s1166_s16 = int_to_ptr.hbm [resolvable:$true] %s1165_s16 }
  0x4e   : > { %v933_v10 = vld [vmem:[#allocation8 + $0x60] sm:$0xff]  ;;  %v931_v14 = vld [vmem:[#allocation8 + $0x50] sm:$0xff]  ;;  %v914_v15 = vld [vmem:[%s1415_s10 + $0x8] sm:$0xff]  ;;  %s1167_s30 = scalar_lea.hbm %s1166_s16, 32  ;;  %s1171_s27 = scalar_lea.hbm %s1493_s5, 64 }
  0x4f   : > { %379 = vmatpush.bf16.msra.mxu0 %v917_v1  ;;  %v925_v11 = vld [vmem:[#allocation8 + $0x20] sm:$0xff]  ;;  %v924_v16 = vld [vmem:[#allocation8 + $0x18] sm:$0xff]  ;;  %v930_v17 = vld [vmem:[#allocation8 + $0x48] sm:$0xff]  ;;  %p1168_p4 = scmp.ne.s32.totalorder %s1166_s16, %s1167_s30  ;;  %p1172_p9 = scmp.lt.s32.totalorder %s1166_s16, %s1493_s5 }
  0x50   : > { %577 = vmatpush.bf16.msra.mxu2 %v935_v4  ;;  %v913_v12 = vld [vmem:[%s1415_s10] sm:$0xff]  ;;  %v922_v20 = vld [vmem:[#allocation8 + $0x8] sm:$0xff]  ;;  %p1173_p13 = scmp.lt.s32.totalorder %s1171_s27, %s1167_s30 }
  0x51   : > { %558 = vmatpush.bf16.msra.mxu1 %v927_v5  ;;  %939 = vmatpush.bf16.msra.mxu3 %v927_v5  ;;  %v923_v18 = vld [vmem:[#allocation8 + $0x10] sm:$0xff]  ;;  %v929_v19 = vld [vmem:[#allocation8 + $0x40] sm:$0xff]  ;;  %v920_v23 = vld [vmem:[%s1425_s1 + $0x8] sm:$0xff]  ;;  %p1169_p1 = pnand %p1168_p4, %p1343_p7 }
  0x52   : > { %v919_v21 = vld [vmem:[%s1425_s1] sm:$0xff]  ;;  %p1174_p0 = por %p1173_p13, %p1172_p9 }
  0x53   : > { %380 = vmatpush.bf16.msra.mxu0 %v916_v6  ;;  %v921_v22 = vld [vmem:[#allocation8] sm:$0xff]  ;;  %p1170_p11 = pneg %p1169_p1 }
  0x54   : > { %578 = vmatpush.bf16.msra.mxu2 %v934_v7  ;;  %v1022_v38 = vld [vmem:[%s1492_s4] ss:$0 sm:$0xff] }
  0x55   : > { %559 = vmatpush.bf16.msra.mxu1 %v926_v8  ;;  %940 = vmatpush.bf16.msra.mxu3 %v926_v8  ;;  %p1175_p3 = pnand %p1174_p0, %p1170_p11 }
  0x57   : > { %381 = vmatpush.bf16.msra.mxu0 %v915_v9 }
  0x58   : > { %579 = vmatpush.bf16.msra.mxu2 %v933_v10 }
  0x59   : > { %560 = vmatpush.bf16.msra.mxu1 %v925_v11  ;;  %941 = vmatpush.bf16.msra.mxu3 %v925_v11 }
  0x5a   : > { %832 = vmatmul.msk.bf16.vlgmr.msra.gmra.mxu0 %vm367_vm0, %v913_v12 }
  0x5c   : > { %580 = vmatpush.bf16.msra.mxu2 %v932_v13 }
  0x5d   : > { %561 = vmatpush.bf16.msra.mxu1 %v924_v16  ;;  %942 = vmatpush.bf16.msra.mxu3 %v924_v16 }
  0x60   : > { %581 = vmatpush.bf16.msra.mxu2 %v931_v14 }
  0x61   : > { %562 = vmatpush.bf16.msra.mxu1 %v923_v18  ;;  %943 = vmatpush.bf16.msra.mxu3 %v923_v18 }
  0x64   : > { %582 = vmatpush.bf16.msra.mxu2 %v930_v17 }
  0x65   : > { %563 = vmatpush.bf16.msra.mxu1 %v922_v20  ;;  %944 = vmatpush.bf16.msra.mxu3 %v922_v20 }
  0x68   : > { %583 = vmatpush.bf16.msra.mxu2 %v929_v19 }
  0x69   : > { %564 = vmatpush.bf16.msra.mxu1 %v921_v22  ;;  %945 = vmatpush.bf16.msra.mxu3 %v921_v22 }
  0x6a   : > { %833 = vmatmul.msk.bf16.gmra.mxu0 %vm367_vm0, %v914_v15 }
  0x6b   : > { %584 = vmatmul.bf16.vlgmr.msra.gmra.mxu2 %v919_v21 }
  0x7b   : > { %589 = vmatmul.bf16.gmra.mxu2 %v920_v23 }
  0xd7   : > { %v383_v24 = vpop.f32.mrf.mxu0 }
  0xd8   : > { %v393_v25 = vpack.c.bf16 %v383_v24, %v383_v24 }
  0xda   : > { %v405_v28 = vunpack.c.l.b16 %v393_v25 }
  0xdf   : > { %v385_v26 = vpop.f32.mrf.mxu0 }
  0xe0   : > { %v394_v27 = vpack.c.bf16 %v385_v26, %v385_v26 }
  0xe2   : > { %v406_v29 = vunpack.c.l.b16 %v394_v27 }
  0xe4   : > { %v409_v30 = vpack.c.b16 %v406_v29, %v405_v28 }
  0xe6   : > { %565 = vmatmul.bf16.vlgmr.msra.gmra.mxu1 %v409_v30 }
  0xe7   : > { %v388_v31 = vpop.f32.mrf.mxu0 }
  0xe8   : > { %v395_v32 = vpack.c.bf16 %v388_v31, %v388_v31 }
  0xea   : > { %v407_v35 = vunpack.c.l.b16 %v395_v32 }
  0xee   : > { %v585_v40 = vpop.f32.mrf.mxu2 }
  0xef   : > { %v390_v33 = vpop.f32.mrf.mxu0 }
  0xf0   : > { %v396_v34 = vpack.c.bf16 %v390_v33, %v390_v33 }
  0xf2   : > { %v408_v36 = vunpack.c.l.b16 %v396_v34 }
  0xf4   : > { %v410_v37 = vpack.c.b16 %v408_v36, %v407_v35 }
  0xf6   : > { %570 = vmatmul.bf16.vlgmr.msra.gmra.mxu3 %v410_v37  ;;  %v587_v46 = vpop.f32.mrf.mxu2 }
  0xfe   : > { %v590_v49 = vpop.f32.mrf.mxu2 }
 0x106   : > { %v592_v56 = vpop.f32.mrf.mxu2 }
 0x163   : > { %v566_v39 = vpop.f32.mrf.mxu1 }
 0x164   : > { %v567_v41 = vadd.f32 %v1022_v38, %v566_v39 }
 0x166   : > { %v586_v42 = vadd.f32 %v585_v40, %v567_v41 }
 0x168   : > { %v595_v43 = vmul.f32 %v586_v42, %v586_v42 }
 0x16a   : > { %599 = vadd.xlane.f32.xlu0 %v595_v43 }
 0x16b   : > { %v568_v44 = vpop.f32.mrf.mxu1 }
 0x16c   : > { %v569_v45 = vadd.f32 %v1022_v38, %v568_v44 }
 0x16e   : > { %v588_v47 = vadd.f32 %v587_v46, %v569_v45 }
 0x170   : > { %v596_v48 = vmul.f32 %v588_v47, %v588_v47 }
 0x172   : > { %601 = vadd.xlane.f32.xlu0 %v596_v48 }
 0x179   : > { %v571_v50 = vpop.f32.mrf.mxu3 }
 0x17a   : > { %v572_v51 = vadd.f32 %v1022_v38, %v571_v50 }
 0x17c   : > { %v591_v52 = vadd.f32 %v590_v49, %v572_v51 }
 0x17e   : > { %v597_v53 = vmul.f32 %v591_v52, %v591_v52 }
 0x180   : > { %603 = vadd.xlane.f32.xlu1 %v597_v53 }
 0x181   : > { %v573_v54 = vpop.f32.mrf.mxu3 }
 0x182   : > { %v574_v55 = vadd.f32 %v1022_v38, %v573_v54 }
 0x184   : > { %v1442_v57 = vadd.f32 %v592_v56, %v574_v55 }
 0x186   : > { %v598_v58 = vmul.f32 %v1442_v57, %v1442_v57 }
 0x188   : > { %605 = vadd.xlane.f32.xlu1 %v598_v58 }
 0x1dd   : > { %v600_v59 = vpop.xlane.xlu0 %599 }
 0x1de   : > { %v607_v60 = vmax.f32 %v600_v59, 1e-24 }
 0x1e0   : > { %1023 = vrsqrt.f32 %v607_v60  ;;  %vm617_vm2 = vweird.f32 %v607_v60 }
 0x1e5   : > { %v602_v61 = vpop.xlane.xlu0 %601 }
 0x1e6   : > { %v1024_v62 = vpop.eup %1023  ;;  %v608_v63 = vmax.f32 %v602_v61, 1e-24 }
 0x1e7   : > { %v612_v0 = vmul.f32 %v1024_v62, %v607_v60  ;;  %vm618_vm1 = vweird.f32 %v1024_v62 }
 0x1e8   : > { %1025 = vrsqrt.f32 %v608_v63  ;;  %vm619_vm3 = vmor %vm617_vm2, %vm618_vm1  ;;  %vm627_vm5 = vweird.f32 %v608_v63 }
 0x1e9   : > { %v613_v1 = vmul.f32 %v1024_v62, %v612_v0 }
 0x1eb   : > { %v614_v2 = vmul.f32 0.5, %v613_v1 }
 0x1ed   : > { %v615_v3 = vsub.f32 1.5, %v614_v2 }
 0x1ee   : > { %v1026_v4 = vpop.eup %1025 }
 0x1ef   : > { %v616_v5 = vmul.f32 %v1024_v62, %v615_v3  ;;  %v622_v6 = vmul.f32 %v1026_v4, %v608_v63  ;;  %vm628_vm4 = vweird.f32 %v1026_v4 }
 0x1f0   : > { %vm629_vm6 = vmor %vm627_vm5, %vm628_vm4 }
 0x1f1   : > { %v620_v7 = vsel %vm619_vm3, %v1024_v62, %v616_v5  ;;  %v623_v8 = vmul.f32 %v1026_v4, %v622_v6 }
 0x1f2   : > { %v651_v9 = vmul.f32 %v620_v7, %v586_v42 }
 0x1f3   : > { %v624_v10 = vmul.f32 0.5, %v623_v8  ;;  %v604_v11 = vpop.xlane.xlu1 %603 }
 0x1f4   : > { %v655_v12 = vmax.f32 %v651_v9, 0.0  ;;  %v609_v13 = vmax.f32 %v604_v11, 1e-24 }
 0x1f5   : > { %v625_v14 = vsub.f32 1.5, %v624_v10 }
 0x1f6   : > { %659 = vst [vmem:[%s1447_s12] sm:$0xff] %v655_v12  ;;  %1027 = vrsqrt.f32 %v609_v13  ;;  %vm637_vm8 = vweird.f32 %v609_v13 }
 0x1f7   : > { %v626_v15 = vmul.f32 %v1026_v4, %v625_v14 }
 0x1f9   : > { %v630_v16 = vsel %vm629_vm6, %v1026_v4, %v626_v15 }
 0x1fa   : > { %v652_v17 = vmul.f32 %v630_v16, %v588_v47 }
 0x1fb   : > { %v606_v18 = vpop.xlane.xlu1 %605 }
 0x1fc   : > { %v1028_v19 = vpop.eup %1027  ;;  %v656_v20 = vmax.f32 %v652_v17, 0.0  ;;  %v610_v21 = vmax.f32 %v606_v18, 1e-24 }
 0x1fd   : > { %v632_v22 = vmul.f32 %v1028_v19, %v609_v13  ;;  %vm638_vm7 = vweird.f32 %v1028_v19 }
 0x1fe   : > { %660 = vst [vmem:[%s1447_s12 + $0x8] sm:$0xff] %v656_v20  ;;  %1029 = vrsqrt.f32 %v610_v21  ;;  %vm639_vm9 = vmor %vm637_vm8, %vm638_vm7  ;;  %vm647_vm11 = vweird.f32 %v610_v21 }
 0x1ff   : > { %v633_v23 = vmul.f32 %v1028_v19, %v632_v22 }
 0x201   : > { %v634_v24 = vmul.f32 0.5, %v633_v23 }
 0x203   : > { %v635_v25 = vsub.f32 1.5, %v634_v24 }
 0x204   : > { %v1030_v26 = vpop.eup %1029 }
 0x205   : > { %v636_v27 = vmul.f32 %v1028_v19, %v635_v25  ;;  %v642_v28 = vmul.f32 %v1030_v26, %v610_v21  ;;  %vm648_vm10 = vweird.f32 %v1030_v26 }
 0x206   : > { %vm649_vm12 = vmor %vm647_vm11, %vm648_vm10 }
 0x207   : > { %v640_v29 = vsel %vm639_vm9, %v1028_v19, %v636_v27  ;;  %v643_v30 = vmul.f32 %v1030_v26, %v642_v28 }
 0x208   : > { %v653_v31 = vmul.f32 %v640_v29, %v591_v52 }
 0x209   : > { %v644_v32 = vmul.f32 0.5, %v643_v30 }
 0x20a   : > { %v657_v33 = vmax.f32 %v653_v31, 0.0 }
 0x20b   : > { %v645_v34 = vsub.f32 1.5, %v644_v32 }
 0x20c   : > { %661 = vst [vmem:[%s1447_s12 + $0x10] sm:$0xff] %v657_v33 }
 0x20d   : > { %v646_v35 = vmul.f32 %v1030_v26, %v645_v34 }
 0x20f   : > { %v650_v36 = vsel %vm649_vm12, %v1030_v26, %v646_v35 }
 0x210   : > { %v654_v37 = vmul.f32 %v650_v36, %v1442_v57 }
 0x212   : > { %v658_v38 = vmax.f32 %v654_v37, 0.0 }
 0x214   : > { %662 = vst [vmem:[%s1447_s12 + $0x18] sm:$0xff] %v658_v38 }
 0x215   : > { %1178 = shalt.err (!%p1175_p3)
}
 0x216   : > { %s1235_s26 = smov 128   ;;  %s1236_s1 = smov 8  }
 0x217   : > { %958 = dma.vmem_to_hbm [thread:$0]  (%p1343_p7), %s677_s17, 512, %s679_s11, %s664_s22, %s1235_s26, %s1235_s26, %s1236_s1  }
 0x218 PF: > { %s693_s24 = sand.u32 1, %s1217_s18   ;;  %p1516_p5 = scmp.ge.s32.totalorder %s1229_s21, 2 }
 0x219   : > { %s694_s29 = scalar_lea.sflag [#allocation4], %s693_s24 }
 0x21a   : > { %p975_p10 = pnand %p1516_p5, %p1302_p6 }
 0x21c   : > { %p976_p8 = pneg %p975_p10 }
 0x21e   : > { %1212 = dma.done.wait (%p976_p8), %s694_s29, 512  }
 0x21f   : > { %1214 = vsyncadd (%p976_p8), %s694_s29, 4294966784  ;;  %s1517_s13 = sld [smem:[#allocation15_spill]]  ;;  %p19_p2 = scmp.ge.s32.totalorder %s1324_s8, 4  }
 0x220   : > { %s1518_s20 = sld [smem:[#allocation16_spill]]  ;;  %s1519_s18 = smov %s1221_s19 }
 0x221   : > { %s1521_s21 = smov %s1324_s8  ;;  %21 = sbr.rel (!%p19_p2) target bundleno = 8 (0x8), region = 104 }
 0x225   : > { %s1520_s19 = smov %s1517_s13 }
 0x226   :  { %700 = vsyncpa [#allocation3], 1 }
 0x227   :  { %702 = vsyncpa [#allocation3 + $0x1], 1 }
 0x228   :  { %703 = vsyncpa [#allocation6], 1 }
 0x229   :  { %704 = vsyncpa [#allocation4], 1 }
 0x22a   :  { %706 = vsyncpa [#allocation4 + $0x1], 1 }

</bundles_post_ra>
